<compile_context>
chip_gen: v7x
topology: tpu7x:2x2x1
jax: 0.10.0
libtpu: 0.0.40
codegen_flags: <defaults>
</compile_context>

<pallas_src>
import math
import jax
import jax.numpy as jnp
from jax.experimental import pallas as pl
from jax.experimental.pallas import tpu as pltpu

# ---- config (small, consistent with the module) ----
BATCH = 2
SEQ = 8
HIDDEN = 32
NUM_HEADS = 4
HEAD_DIM = HIDDEN // NUM_HEADS


def bert_self_attention_kernel(h_ref, wqkv_ref, bqkv_ref, mask_ref, o_ref):
    """Processes a block of `bb` batch elements.

    h_ref:    (bb, S, H)   hidden states
    wqkv_ref: (H, 3H)      fused [Wq | Wk | Wv] in (in, out) layout
    bqkv_ref: (1, 3H)      fused [bq | bk | bv]
    mask_ref: (bb, 1, S)   additive attention mask (broadcast over queries)
    o_ref:    (bb, S, H)   context output
    """
    bb, S, H = h_ref.shape
    NH, D = NUM_HEADS, HEAD_DIM
    G = bb * NH

    x = h_ref[...].reshape(bb * S, H)                          # [bb*S, H]

    # Single fused QKV projection on the MXU ([bb*S, H] x [H, 3H]) instead of
    # three narrow per-matrix matmuls; bias added once.
    qkv = jnp.dot(x, wqkv_ref[...],
                  preferred_element_type=jnp.float32) + bqkv_ref[0]

    # Fold the 1/sqrt(D) score scale into q once (one [bb*S, H] VPU mul).
    q = qkv[:, 0 * H:1 * H] * (1.0 / math.sqrt(D))
    k = qkv[:, 1 * H:2 * H]
    v = qkv[:, 2 * H:3 * H]

    # Split heads onto a leading group axis g = (batch, head) with static
    # slices + stack (no in-kernel transposes / relayouts).
    def split_heads(t):                                        # [bb*S,H] -> [G,S,D]
        return jnp.stack([t[b * S:(b + 1) * S, h * D:(h + 1) * D]
                          for b in range(bb) for h in range(NH)])

    qh, kh, vh = split_heads(q), split_heads(k), split_heads(v)

    # All (batch, head) score matrices in one batched contraction over d —
    # contraction is the last dim of BOTH operands, so no explicit k^T.
    scores = jnp.einsum('gqd,gkd->gqk', qh, kh,
                        preferred_element_type=jnp.float32)    # [G, S, S]

    # Additive mask, replicated per head once (hoisted out of any loop).
    mask = mask_ref[...]                                       # [bb, 1, S]
    mask_g = jnp.stack([mask[g // NH] for g in range(G)])      # [G, 1, S]
    scores = scores + mask_g                                   # broadcast over q

    # Numerically-stable softmax over keys; reciprocal runs on the EUP.
    scores = scores - jnp.max(scores, axis=-1, keepdims=True)
    p = jnp.exp(scores)
    p = p * pl.reciprocal(jnp.sum(p, axis=-1, keepdims=True), approx=True)
    # TODO(synk): attention-probs dropout skipped (eval-mode identity).

    # Batched context matmul over all (batch, head) groups.
    ctx = jnp.einsum('gqk,gkd->gqd', p, vh,
                     preferred_element_type=jnp.float32)       # [G, S, D]

    # Re-assemble heads along the lane axis (== permute(0,2,1,3)+view in the
    # original) and do a single lane-dense [bb, S, H] store.
    rows = [jnp.concatenate([ctx[b * NH + h] for h in range(NH)], axis=-1)
            for b in range(bb)]                                # bb x [S, H]
    o_ref[...] = jnp.stack(rows).astype(o_ref.dtype)           # [bb, S, H]


def bert_self_attention(hidden_states, wq, wk, wv, bq, bk, bv, attention_mask,
                        *, batch_parallel=False):
    """batch_parallel=False: one grid step over the whole batch (minimal
    per-step overhead; best for single-TensorCore v5e/v6e).
    batch_parallel=True : grid=(B,) with dimension_semantics=('parallel',) so
    batch elements shard across TensorCores (best for dual-TC v7x)."""
    B, S, H = hidden_states.shape
    # Fuse the three projections outside the kernel (done once per call).
    wqkv = jnp.concatenate([wq, wk, wv], axis=1)               # [H, 3H]
    bqkv = jnp.concatenate([bq, bk, bv], axis=1)               # [1, 3H]

    if batch_parallel:
        grid, bb, sem = (B,), 1, ("parallel",)
    else:
        grid, bb, sem = (1,), B, ("arbitrary",)

    return pl.pallas_call(
        bert_self_attention_kernel,
        out_shape=jax.ShapeDtypeStruct((B, S, H), jnp.float32),
        grid_spec=pltpu.PrefetchScalarGridSpec(
            num_scalar_prefetch=0,
            grid=grid,
            in_specs=[
                pl.BlockSpec((bb, S, H), lambda b: (b, 0, 0)),     # hidden_states
                pl.BlockSpec((H, 3 * H), lambda b: (0, 0)),        # fused Wqkv
                pl.BlockSpec((1, 3 * H), lambda b: (0, 0)),        # fused bqkv
                pl.BlockSpec((bb, 1, S), lambda b: (b, 0, 0)),     # additive mask
            ],
            out_specs=pl.BlockSpec((bb, S, H), lambda b: (b, 0, 0)),
        ),
        compiler_params=pltpu.CompilerParams(dimension_semantics=sem),
    )(hidden_states, wqkv, bqkv, attention_mask)


def reference(hidden_states, wq, wk, wv, bq, bk, bv, attention_mask):
    B, S, H = hidden_states.shape
    q = hidden_states @ wq + bq[0]
    k = hidden_states @ wk + bk[0]
    v = hidden_states @ wv + bv[0]

    def split(x):
        return x.reshape(B, S, NUM_HEADS, HEAD_DIM).transpose(0, 2, 1, 3)

    qh, kh, vh = split(q), split(k), split(v)
    scores = jnp.einsum('bhqd,bhkd->bhqk', qh, kh) / math.sqrt(HEAD_DIM)
    scores = scores + attention_mask[:, None, :, :]          # [B,1,1,S] broadcast
    probs = jax.nn.softmax(scores, axis=-1)
    ctx = jnp.einsum('bhqk,bhkd->bhqd', probs, vh)
    return ctx.transpose(0, 2, 1, 3).reshape(B, S, H)


if __name__ == "__main__":
    key = jax.random.PRNGKey(0)
    k0, k1, k2, k3, k4, k5, k6, k7 = jax.random.split(key, 8)

    hidden_states = jax.random.normal(k0, (BATCH, SEQ, HIDDEN), dtype=jnp.float32)
    wq = jax.random.normal(k1, (HIDDEN, HIDDEN), dtype=jnp.float32) * 0.05
    wk = jax.random.normal(k2, (HIDDEN, HIDDEN), dtype=jnp.float32) * 0.05
    wv = jax.random.normal(k3, (HIDDEN, HIDDEN), dtype=jnp.float32) * 0.05
    bq = jax.random.normal(k4, (1, HIDDEN), dtype=jnp.float32) * 0.01
    bk = jax.random.normal(k5, (1, HIDDEN), dtype=jnp.float32) * 0.01
    bv = jax.random.normal(k6, (1, HIDDEN), dtype=jnp.float32) * 0.01
    # additive attention mask (all zeros = no masking), shape [B, 1, S]
    attention_mask = jnp.zeros((BATCH, 1, SEQ), dtype=jnp.float32)

    ref = reference(hidden_states, wq, wk, wv, bq, bk, bv, attention_mask)

    # Collapsed-grid variant (single step; recommended for single-TC v5e/v6e).
    out_single = bert_self_attention(hidden_states, wq, wk, wv, bq, bk, bv,
                                     attention_mask, batch_parallel=False)
    # Batch-parallel variant (recommended for dual-TC v7x).
    out_parallel = bert_self_attention(hidden_states, wq, wk, wv, bq, bk, bv,
                                       attention_mask, batch_parallel=True)
    out_single = jax.block_until_ready(out_single)
    out_parallel = jax.block_until_ready(out_parallel)

    assert out_single.shape == (BATCH, SEQ, HIDDEN)
    assert out_parallel.shape == (BATCH, SEQ, HIDDEN)
    # Tolerance relaxed slightly vs exact divide because the softmax uses the
    # EUP approximate reciprocal (pl.reciprocal(..., approx=True)).
    assert jnp.allclose(out_single, ref, atol=2e-3, rtol=2e-3), \
        "mismatch vs reference (collapsed grid)"
    assert jnp.allclose(out_parallel, ref, atol=2e-3, rtol=2e-3), \
        "mismatch vs reference (batch-parallel grid)"

    print("KERNEL_OK")
</pallas_src>

<mosaic_0001>
module attributes {stable_mosaic.version = 11 : i64} {
  func.func @bert_self_attention_kernel(%arg0: i32, %arg1: memref<2x8x32xf32, #tpu.memory_space<vmem>>, %arg2: memref<32x96xf32, #tpu.memory_space<vmem>>, %arg3: memref<1x96xf32, #tpu.memory_space<vmem>>, %arg4: memref<2x1x8xf32, #tpu.memory_space<vmem>>, %arg5: memref<2x8x32xf32, #tpu.memory_space<vmem>>) attributes {dimension_semantics = [#tpu.dimension_semantics<arbitrary>], iteration_bounds = array<i64: 1>, scalar_prefetch = 0 : i64, scratch_operands = 0 : i64, tpu.core_type = #tpu.core_type<tc>, window_params = [{transform_indices = @transform_0, window_bounds = array<i64: 2, 8, 32>}, {pipeline_mode = #tpu.pipeline_mode<synchronous>, transform_indices = @transform_1, window_bounds = array<i64: 32, 96>}, {pipeline_mode = #tpu.pipeline_mode<synchronous>, transform_indices = @transform_2, window_bounds = array<i64: 1, 96>}, {transform_indices = @transform_3, window_bounds = array<i64: 2, 1, 8>}, {transform_indices = @transform_4, window_bounds = array<i64: 2, 8, 32>}]} {
    %c0 = arith.constant 0 : index
    %c0_0 = arith.constant 0 : index
    %c0_1 = arith.constant 0 : index
    %0 = vector.load %arg1[%c0, %c0_0, %c0_1] : memref<2x8x32xf32, #tpu.memory_space<vmem>>, vector<2x8x32xf32>
    %1 = vector.shape_cast %0 : vector<2x8x32xf32> to vector<16x32xf32>
    %c0_2 = arith.constant 0 : index
    %c0_3 = arith.constant 0 : index
    %2 = vector.load %arg2[%c0_2, %c0_3] : memref<32x96xf32, #tpu.memory_space<vmem>>, vector<32x96xf32>
    %cst = arith.constant dense<0.000000e+00> : vector<16x96xf32>
    %3 = tpu.matmul %1, %2, %cst {dimension_numbers = #tpu.dot_dimension_numbers<[1], [0], [0], [1], [0, 0, 1, 1], [], []>} : vector<16x32xf32>, vector<32x96xf32>, vector<16x96xf32> -> vector<16x96xf32>
    %c0_4 = arith.constant 0 : index
    %c0_5 = arith.constant 0 : index
    %4 = vector.load %arg3[%c0_4, %c0_5] : memref<1x96xf32, #tpu.memory_space<vmem>>, vector<1x96xf32>
    %5 = vector.shape_cast %4 : vector<1x96xf32> to vector<96xf32>
    %6 = vector.shape_cast %5 : vector<96xf32> to vector<1x96xf32>
    %7 = vector.broadcast %6 : vector<1x96xf32> to vector<16x96xf32>
    %8 = arith.addf %3, %7 : vector<16x96xf32>
    %9 = vector.extract_strided_slice %8 {offsets = [0, 0], sizes = [16, 32], strides = [1, 1]} : vector<16x96xf32> to vector<16x32xf32>
    %cst_6 = arith.constant 0.353553385 : f32
    %10 = vector.broadcast %cst_6 : f32 to vector<16x32xf32>
    %11 = arith.mulf %9, %10 : vector<16x32xf32>
    %12 = vector.extract_strided_slice %8 {offsets = [0, 32], sizes = [16, 32], strides = [1, 1]} : vector<16x96xf32> to vector<16x32xf32>
    %13 = vector.extract_strided_slice %8 {offsets = [0, 64], sizes = [16, 32], strides = [1, 1]} : vector<16x96xf32> to vector<16x32xf32>
    %14 = vector.extract_strided_slice %11 {offsets = [0, 0], sizes = [8, 8], strides = [1, 1]} : vector<16x32xf32> to vector<8x8xf32>
    %15 = vector.extract_strided_slice %11 {offsets = [0, 8], sizes = [8, 8], strides = [1, 1]} : vector<16x32xf32> to vector<8x8xf32>
    %16 = vector.extract_strided_slice %11 {offsets = [0, 16], sizes = [8, 8], strides = [1, 1]} : vector<16x32xf32> to vector<8x8xf32>
    %17 = vector.extract_strided_slice %11 {offsets = [0, 24], sizes = [8, 8], strides = [1, 1]} : vector<16x32xf32> to vector<8x8xf32>
    %18 = vector.extract_strided_slice %11 {offsets = [8, 0], sizes = [8, 8], strides = [1, 1]} : vector<16x32xf32> to vector<8x8xf32>
    %19 = vector.extract_strided_slice %11 {offsets = [8, 8], sizes = [8, 8], strides = [1, 1]} : vector<16x32xf32> to vector<8x8xf32>
    %20 = vector.extract_strided_slice %11 {offsets = [8, 16], sizes = [8, 8], strides = [1, 1]} : vector<16x32xf32> to vector<8x8xf32>
    %21 = vector.extract_strided_slice %11 {offsets = [8, 24], sizes = [8, 8], strides = [1, 1]} : vector<16x32xf32> to vector<8x8xf32>
    %22 = vector.shape_cast %14 : vector<8x8xf32> to vector<1x8x8xf32>
    %23 = vector.shape_cast %15 : vector<8x8xf32> to vector<1x8x8xf32>
    %24 = vector.shape_cast %16 : vector<8x8xf32> to vector<1x8x8xf32>
    %25 = vector.shape_cast %17 : vector<8x8xf32> to vector<1x8x8xf32>
    %26 = vector.shape_cast %18 : vector<8x8xf32> to vector<1x8x8xf32>
    %27 = vector.shape_cast %19 : vector<8x8xf32> to vector<1x8x8xf32>
    %28 = vector.shape_cast %20 : vector<8x8xf32> to vector<1x8x8xf32>
    %29 = vector.shape_cast %21 : vector<8x8xf32> to vector<1x8x8xf32>
    %30 = tpu.concatenate %22, %23, %24, %25, %26, %27, %28, %29 in 0 : vector<1x8x8xf32>, vector<1x8x8xf32>, vector<1x8x8xf32>, vector<1x8x8xf32>, vector<1x8x8xf32>, vector<1x8x8xf32>, vector<1x8x8xf32>, vector<1x8x8xf32> -> vector<8x8x8xf32>
    %31 = vector.extract_strided_slice %12 {offsets = [0, 0], sizes = [8, 8], strides = [1, 1]} : vector<16x32xf32> to vector<8x8xf32>
    %32 = vector.extract_strided_slice %12 {offsets = [0, 8], sizes = [8, 8], strides = [1, 1]} : vector<16x32xf32> to vector<8x8xf32>
    %33 = vector.extract_strided_slice %12 {offsets = [0, 16], sizes = [8, 8], strides = [1, 1]} : vector<16x32xf32> to vector<8x8xf32>
    %34 = vector.extract_strided_slice %12 {offsets = [0, 24], sizes = [8, 8], strides = [1, 1]} : vector<16x32xf32> to vector<8x8xf32>
    %35 = vector.extract_strided_slice %12 {offsets = [8, 0], sizes = [8, 8], strides = [1, 1]} : vector<16x32xf32> to vector<8x8xf32>
    %36 = vector.extract_strided_slice %12 {offsets = [8, 8], sizes = [8, 8], strides = [1, 1]} : vector<16x32xf32> to vector<8x8xf32>
    %37 = vector.extract_strided_slice %12 {offsets = [8, 16], sizes = [8, 8], strides = [1, 1]} : vector<16x32xf32> to vector<8x8xf32>
    %38 = vector.extract_strided_slice %12 {offsets = [8, 24], sizes = [8, 8], strides = [1, 1]} : vector<16x32xf32> to vector<8x8xf32>
    %39 = vector.shape_cast %31 : vector<8x8xf32> to vector<1x8x8xf32>
    %40 = vector.shape_cast %32 : vector<8x8xf32> to vector<1x8x8xf32>
    %41 = vector.shape_cast %33 : vector<8x8xf32> to vector<1x8x8xf32>
    %42 = vector.shape_cast %34 : vector<8x8xf32> to vector<1x8x8xf32>
    %43 = vector.shape_cast %35 : vector<8x8xf32> to vector<1x8x8xf32>
    %44 = vector.shape_cast %36 : vector<8x8xf32> to vector<1x8x8xf32>
    %45 = vector.shape_cast %37 : vector<8x8xf32> to vector<1x8x8xf32>
    %46 = vector.shape_cast %38 : vector<8x8xf32> to vector<1x8x8xf32>
    %47 = tpu.concatenate %39, %40, %41, %42, %43, %44, %45, %46 in 0 : vector<1x8x8xf32>, vector<1x8x8xf32>, vector<1x8x8xf32>, vector<1x8x8xf32>, vector<1x8x8xf32>, vector<1x8x8xf32>, vector<1x8x8xf32>, vector<1x8x8xf32> -> vector<8x8x8xf32>
    %48 = vector.extract_strided_slice %13 {offsets = [0, 0], sizes = [8, 8], strides = [1, 1]} : vector<16x32xf32> to vector<8x8xf32>
    %49 = vector.extract_strided_slice %13 {offsets = [0, 8], sizes = [8, 8], strides = [1, 1]} : vector<16x32xf32> to vector<8x8xf32>
    %50 = vector.extract_strided_slice %13 {offsets = [0, 16], sizes = [8, 8], strides = [1, 1]} : vector<16x32xf32> to vector<8x8xf32>
    %51 = vector.extract_strided_slice %13 {offsets = [0, 24], sizes = [8, 8], strides = [1, 1]} : vector<16x32xf32> to vector<8x8xf32>
    %52 = vector.extract_strided_slice %13 {offsets = [8, 0], sizes = [8, 8], strides = [1, 1]} : vector<16x32xf32> to vector<8x8xf32>
    %53 = vector.extract_strided_slice %13 {offsets = [8, 8], sizes = [8, 8], strides = [1, 1]} : vector<16x32xf32> to vector<8x8xf32>
    %54 = vector.extract_strided_slice %13 {offsets = [8, 16], sizes = [8, 8], strides = [1, 1]} : vector<16x32xf32> to vector<8x8xf32>
    %55 = vector.extract_strided_slice %13 {offsets = [8, 24], sizes = [8, 8], strides = [1, 1]} : vector<16x32xf32> to vector<8x8xf32>
    %56 = vector.shape_cast %48 : vector<8x8xf32> to vector<1x8x8xf32>
    %57 = vector.shape_cast %49 : vector<8x8xf32> to vector<1x8x8xf32>
    %58 = vector.shape_cast %50 : vector<8x8xf32> to vector<1x8x8xf32>
    %59 = vector.shape_cast %51 : vector<8x8xf32> to vector<1x8x8xf32>
    %60 = vector.shape_cast %52 : vector<8x8xf32> to vector<1x8x8xf32>
    %61 = vector.shape_cast %53 : vector<8x8xf32> to vector<1x8x8xf32>
    %62 = vector.shape_cast %54 : vector<8x8xf32> to vector<1x8x8xf32>
    %63 = vector.shape_cast %55 : vector<8x8xf32> to vector<1x8x8xf32>
    %64 = tpu.concatenate %56, %57, %58, %59, %60, %61, %62, %63 in 0 : vector<1x8x8xf32>, vector<1x8x8xf32>, vector<1x8x8xf32>, vector<1x8x8xf32>, vector<1x8x8xf32>, vector<1x8x8xf32>, vector<1x8x8xf32>, vector<1x8x8xf32> -> vector<8x8x8xf32>
    "tpu.trace_start"() <{level = 10 : i32, message = "gqd,gkd->gqk"}> : () -> ()
    %cst_7 = arith.constant dense<0.000000e+00> : vector<8x8x8xf32>
    %65 = tpu.matmul %30, %47, %cst_7 {dimension_numbers = #tpu.dot_dimension_numbers<[2], [2], [1], [1], [0, 0, 0, 1, 1, 1], [0], [0]>} : vector<8x8x8xf32>, vector<8x8x8xf32>, vector<8x8x8xf32> -> vector<8x8x8xf32>
    "tpu.trace_stop"() : () -> ()
    %c0_8 = arith.constant 0 : index
    %c0_9 = arith.constant 0 : index
    %c0_10 = arith.constant 0 : index
    %66 = vector.load %arg4[%c0_8, %c0_9, %c0_10] : memref<2x1x8xf32, #tpu.memory_space<vmem>>, vector<2x1x8xf32>
    %67 = vector.extract_strided_slice %66 {offsets = [0, 0, 0], sizes = [1, 1, 8], strides = [1, 1, 1]} : vector<2x1x8xf32> to vector<1x1x8xf32>
    %68 = vector.shape_cast %67 : vector<1x1x8xf32> to vector<1x8xf32>
    %69 = vector.extract_strided_slice %66 {offsets = [0, 0, 0], sizes = [1, 1, 8], strides = [1, 1, 1]} : vector<2x1x8xf32> to vector<1x1x8xf32>
    %70 = vector.shape_cast %69 : vector<1x1x8xf32> to vector<1x8xf32>
    %71 = vector.extract_strided_slice %66 {offsets = [0, 0, 0], sizes = [1, 1, 8], strides = [1, 1, 1]} : vector<2x1x8xf32> to vector<1x1x8xf32>
    %72 = vector.shape_cast %71 : vector<1x1x8xf32> to vector<1x8xf32>
    %73 = vector.extract_strided_slice %66 {offsets = [0, 0, 0], sizes = [1, 1, 8], strides = [1, 1, 1]} : vector<2x1x8xf32> to vector<1x1x8xf32>
    %74 = vector.shape_cast %73 : vector<1x1x8xf32> to vector<1x8xf32>
    %75 = vector.extract_strided_slice %66 {offsets = [1, 0, 0], sizes = [1, 1, 8], strides = [1, 1, 1]} : vector<2x1x8xf32> to vector<1x1x8xf32>
    %76 = vector.shape_cast %75 : vector<1x1x8xf32> to vector<1x8xf32>
    %77 = vector.extract_strided_slice %66 {offsets = [1, 0, 0], sizes = [1, 1, 8], strides = [1, 1, 1]} : vector<2x1x8xf32> to vector<1x1x8xf32>
    %78 = vector.shape_cast %77 : vector<1x1x8xf32> to vector<1x8xf32>
    %79 = vector.extract_strided_slice %66 {offsets = [1, 0, 0], sizes = [1, 1, 8], strides = [1, 1, 1]} : vector<2x1x8xf32> to vector<1x1x8xf32>
    %80 = vector.shape_cast %79 : vector<1x1x8xf32> to vector<1x8xf32>
    %81 = vector.extract_strided_slice %66 {offsets = [1, 0, 0], sizes = [1, 1, 8], strides = [1, 1, 1]} : vector<2x1x8xf32> to vector<1x1x8xf32>
    %82 = vector.shape_cast %81 : vector<1x1x8xf32> to vector<1x8xf32>
    %83 = vector.shape_cast %68 : vector<1x8xf32> to vector<1x1x8xf32>
    %84 = vector.shape_cast %70 : vector<1x8xf32> to vector<1x1x8xf32>
    %85 = vector.shape_cast %72 : vector<1x8xf32> to vector<1x1x8xf32>
    %86 = vector.shape_cast %74 : vector<1x8xf32> to vector<1x1x8xf32>
    %87 = vector.shape_cast %76 : vector<1x8xf32> to vector<1x1x8xf32>
    %88 = vector.shape_cast %78 : vector<1x8xf32> to vector<1x1x8xf32>
    %89 = vector.shape_cast %80 : vector<1x8xf32> to vector<1x1x8xf32>
    %90 = vector.shape_cast %82 : vector<1x8xf32> to vector<1x1x8xf32>
    %91 = tpu.concatenate %83, %84, %85, %86, %87, %88, %89, %90 in 0 : vector<1x1x8xf32>, vector<1x1x8xf32>, vector<1x1x8xf32>, vector<1x1x8xf32>, vector<1x1x8xf32>, vector<1x1x8xf32>, vector<1x1x8xf32>, vector<1x1x8xf32> -> vector<8x1x8xf32>
    %92 = vector.broadcast %91 : vector<8x1x8xf32> to vector<8x8x8xf32>
    %93 = arith.addf %65, %92 : vector<8x8x8xf32>
    %cst_11 = arith.constant dense<0xFF800000> : vector<8x8xf32>
    %94 = vector.multi_reduction <maximumf>, %93, %cst_11 [2] : vector<8x8x8xf32> to vector<8x8xf32>
    %95 = vector.shape_cast %94 : vector<8x8xf32> to vector<8x8x1xf32>
    %96 = vector.broadcast %95 : vector<8x8x1xf32> to vector<8x8x8xf32>
    %97 = arith.subf %93, %96 : vector<8x8x8xf32>
    %98 = math.exp %97 : vector<8x8x8xf32>
    %cst_12 = arith.constant dense<0.000000e+00> : vector<8x8xf32>
    %99 = vector.multi_reduction <add>, %98, %cst_12 [2] : vector<8x8x8xf32> to vector<8x8xf32>
    %100 = vector.shape_cast %99 : vector<8x8xf32> to vector<8x8x1xf32>
    %101 = tpu.reciprocal %100 {approx = true} : vector<8x8x1xf32> -> vector<8x8x1xf32>
    %102 = vector.broadcast %101 : vector<8x8x1xf32> to vector<8x8x8xf32>
    %103 = arith.mulf %98, %102 : vector<8x8x8xf32>
    "tpu.trace_start"() <{level = 10 : i32, message = "gqk,gkd->gqd"}> : () -> ()
    %cst_13 = arith.constant dense<0.000000e+00> : vector<8x8x8xf32>
    %104 = tpu.matmul %103, %64, %cst_13 {dimension_numbers = #tpu.dot_dimension_numbers<[2], [1], [1], [2], [0, 0, 0, 1, 1, 2], [0], [0]>} : vector<8x8x8xf32>, vector<8x8x8xf32>, vector<8x8x8xf32> -> vector<8x8x8xf32>
    "tpu.trace_stop"() : () -> ()
    %105 = vector.extract_strided_slice %104 {offsets = [0, 0, 0], sizes = [1, 8, 8], strides = [1, 1, 1]} : vector<8x8x8xf32> to vector<1x8x8xf32>
    %106 = vector.shape_cast %105 : vector<1x8x8xf32> to vector<8x8xf32>
    %107 = vector.extract_strided_slice %104 {offsets = [1, 0, 0], sizes = [1, 8, 8], strides = [1, 1, 1]} : vector<8x8x8xf32> to vector<1x8x8xf32>
    %108 = vector.shape_cast %107 : vector<1x8x8xf32> to vector<8x8xf32>
    %109 = vector.extract_strided_slice %104 {offsets = [2, 0, 0], sizes = [1, 8, 8], strides = [1, 1, 1]} : vector<8x8x8xf32> to vector<1x8x8xf32>
    %110 = vector.shape_cast %109 : vector<1x8x8xf32> to vector<8x8xf32>
    %111 = vector.extract_strided_slice %104 {offsets = [3, 0, 0], sizes = [1, 8, 8], strides = [1, 1, 1]} : vector<8x8x8xf32> to vector<1x8x8xf32>
    %112 = vector.shape_cast %111 : vector<1x8x8xf32> to vector<8x8xf32>
    %113 = tpu.concatenate %106, %108, %110, %112 in 1 : vector<8x8xf32>, vector<8x8xf32>, vector<8x8xf32>, vector<8x8xf32> -> vector<8x32xf32>
    %114 = vector.extract_strided_slice %104 {offsets = [4, 0, 0], sizes = [1, 8, 8], strides = [1, 1, 1]} : vector<8x8x8xf32> to vector<1x8x8xf32>
    %115 = vector.shape_cast %114 : vector<1x8x8xf32> to vector<8x8xf32>
    %116 = vector.extract_strided_slice %104 {offsets = [5, 0, 0], sizes = [1, 8, 8], strides = [1, 1, 1]} : vector<8x8x8xf32> to vector<1x8x8xf32>
    %117 = vector.shape_cast %116 : vector<1x8x8xf32> to vector<8x8xf32>
    %118 = vector.extract_strided_slice %104 {offsets = [6, 0, 0], sizes = [1, 8, 8], strides = [1, 1, 1]} : vector<8x8x8xf32> to vector<1x8x8xf32>
    %119 = vector.shape_cast %118 : vector<1x8x8xf32> to vector<8x8xf32>
    %120 = vector.extract_strided_slice %104 {offsets = [7, 0, 0], sizes = [1, 8, 8], strides = [1, 1, 1]} : vector<8x8x8xf32> to vector<1x8x8xf32>
    %121 = vector.shape_cast %120 : vector<1x8x8xf32> to vector<8x8xf32>
    %122 = tpu.concatenate %115, %117, %119, %121 in 1 : vector<8x8xf32>, vector<8x8xf32>, vector<8x8xf32>, vector<8x8xf32> -> vector<8x32xf32>
    %123 = vector.shape_cast %113 : vector<8x32xf32> to vector<1x8x32xf32>
    %124 = vector.shape_cast %122 : vector<8x32xf32> to vector<1x8x32xf32>
    %125 = tpu.concatenate %123, %124 in 0 : vector<1x8x32xf32>, vector<1x8x32xf32> -> vector<2x8x32xf32>
    %c0_14 = arith.constant 0 : index
    %c0_15 = arith.constant 0 : index
    %c0_16 = arith.constant 0 : index
    %126 = vector.load %arg5[%c0_14, %c0_15, %c0_16] : memref<2x8x32xf32, #tpu.memory_space<vmem>>, vector<2x8x32xf32>
    tpu.vector_store %arg5[%c0_14, %c0_15, %c0_16], %125 {strides = array<i32>} : memref<2x8x32xf32, #tpu.memory_space<vmem>>, vector<2x8x32xf32>,
    return
  }
  func.func @transform_0(%arg0: i32) -> (i32, i32, i32) {
    %c0_i32 = arith.constant 0 : i32
    %c0_i32_0 = arith.constant 0 : i32
    %c0_i32_1 = arith.constant 0 : i32
    return %arg0, %c0_i32, %c0_i32_0 : i32, i32, i32
  }
  func.func @transform_1(%arg0: i32) -> (i32, i32) {
    %c0_i32 = arith.constant 0 : i32
    %c0_i32_0 = arith.constant 0 : i32
    %c0_i32_1 = arith.constant 0 : i32
    return %c0_i32, %c0_i32_0 : i32, i32
  }
  func.func @transform_2(%arg0: i32) -> (i32, i32) {
    %c0_i32 = arith.constant 0 : i32
    %c0_i32_0 = arith.constant 0 : i32
    %c0_i32_1 = arith.constant 0 : i32
    return %c0_i32, %c0_i32_0 : i32, i32
  }
  func.func @transform_3(%arg0: i32) -> (i32, i32, i32) {
    %c0_i32 = arith.constant 0 : i32
    %c0_i32_0 = arith.constant 0 : i32
    %c0_i32_1 = arith.constant 0 : i32
    return %arg0, %c0_i32, %c0_i32_0 : i32, i32, i32
  }
  func.func @transform_4(%arg0: i32) -> (i32, i32, i32) {
    %c0_i32 = arith.constant 0 : i32
    %c0_i32_0 = arith.constant 0 : i32
    %c0_i32_1 = arith.constant 0 : i32
    return %arg0, %c0_i32, %c0_i32_0 : i32, i32, i32
  }
}

</mosaic_0001>

<bundles_post_ra>
// kernel: tpu_custom_call.1
= control target key start
LH: loop header
LB: loop body
LE: loop exit
PB: predicated region body
PF: predicated region fallthrough
CT: control target
= control target key end

     0   :  { %9 = vsyncpa [#allocation3], 0  ;;  %s2075_s0 = inlined_call_operand.hbm [shape: f32[2,8,32], index: 0, kind: input, shape index: {}]   ;;  %s2076_s1 = inlined_call_operand.hbm [shape: f32[32,96], index: 1, kind: input, shape index: {}]   ;;  %s2077_s2 = inlined_call_operand.vmem [shape: f32[1,96], index: 2, kind: input, shape index: {}]   ;;  %s2078_s3 = inlined_call_operand.vmem [shape: f32[2,1,8], index: 3, kind: input, shape index: {}]   ;;  %s2079_s4 = inlined_call_operand.hbm [shape: f32[2,8,32], index: 4, kind: output, shape index: {}]  }
   0x1   :  { %10 = vsyncpa [#allocation6], 0 }
   0x2   :  { %11 = vsyncpa [#allocation4], 0  ;;  %s1826_s15 = smov [#allocation2]   ;;  %s1754_s19 = scalar_lea.hbm %s2075_s0, 256 }
   0x3   :  { %s17_s16 = sshll.u32 %s1826_s15, 4  ;;  %p1755_p0 = scmp.ne.s32.totalorder %s2075_s0, %s1754_s19  ;;  %s18_s16 = int_to_ptr.vmem [resolvable:$true] %s17_s16 }
   0x4   :  { %p1758_p1 = scmp.lt.u32.totalorder %s1754_s19, %s2075_s0 }
   0x6   :  { %p1760_p2 = pnand %p1758_p1, %p1755_p0 }
   0x8   :  { %1763 = shalt.err (!%p1760_p2)
}
   0x9   :  { %s1764_s24 = scalar_lea.vmem %s18_s16, 256  ;;  %p1769_p4 = scmp.lt.s32.totalorder %s18_s16, %s18_s16 }
   0xa   :  { %p1765_p3 = scmp.ne.s32.totalorder %s18_s16, %s1764_s24  ;;  %p1770_p5 = scmp.lt.s32.totalorder %s1764_s24, %s1764_s24 }
   0xc   :  { %p1771_p6 = por %p1770_p5, %p1769_p4 }
   0xe   :  { %p1772_p7 = pnand %p1771_p6, %p1765_p3 }
  0x10   :  { %1775 = shalt.err (!%p1772_p7)
}
  0x11   :  { %s1827_s25 = smov 128   ;;  %s1828_s26 = smov 8  }
  0x12   :  { %23 = dma.hbm_to_vmem [thread:$0]  %s2075_s0, 256, %s18_s16, [#allocation3], %s1827_s25, %s1827_s25, %s1828_s26  }
  0x13   :  { %s1829_s29 = smov [#allocation5]   ;;  %s1776_s7 = scalar_lea.hbm %s2076_s1, 512 }
  0x14   :  { %s29_s30 = sshll.u32 %s1829_s29, 4  ;;  %p1777_p8 = scmp.ne.s32.totalorder %s2076_s1, %s1776_s7  ;;  %s30_s30 = int_to_ptr.vmem [resolvable:$true] %s29_s30 }
  0x15   :  { %p1780_p9 = scmp.lt.u32.totalorder %s1776_s7, %s2076_s1 }
  0x17   :  { %p1782_p10 = pnand %p1780_p9, %p1777_p8 }
  0x19   :  { %1785 = shalt.err (!%p1782_p10)
}
  0x1a   :  { %s1786_s12 = scalar_lea.vmem %s30_s30, 512  ;;  %p1791_p12 = scmp.lt.s32.totalorder %s30_s30, %s30_s30 }
  0x1b   :  { %p1787_p11 = scmp.ne.s32.totalorder %s30_s30, %s1786_s12  ;;  %p1792_p13 = scmp.lt.s32.totalorder %s1786_s12, %s1786_s12 }
  0x1d   :  { %p1793_p0 = por %p1792_p13, %p1791_p12 }
  0x1f   :  { %p1794_p1 = pnand %p1793_p0, %p1787_p11 }
  0x21   :  { %1797 = shalt.err (!%p1794_p1)
}
  0x22   :  { %35 = dma.hbm_to_vmem [thread:$0]  %s2076_s1, 512, %s30_s30, [#allocation6], %s1827_s25, %s1827_s25, %s1828_s26  }
  0x23   :  { %1820 = dma.done.wait [#allocation3], 256  }
  0x24   :  { %1821 = vsyncadd [#allocation3], 4294967040 }
  0x25   :  { %1822 = dma.done.wait [#allocation6], 512  }
  0x26   :  { %1823 = vsyncadd [#allocation6], 4294966784  ;;  %vm59_vm0 = vcmask 261120   ;;  %v48_v0 = vld [vmem:[#allocation5] sm:$0xff]  ;;  %v49_v1 = vld [vmem:[#allocation5 + $0x8] sm:$0xff]  ;;  %v1830_v10 = vmov 0.0  }
  0x27   :  { %v50_v2 = vld [vmem:[#allocation5 + $0x10] sm:$0xff]  ;;  %v1700_v3 = vpack.c.bf16 %v49_v1, %v48_v0  ;;  %v51_v4 = vld [vmem:[#allocation5 + $0x18] sm:$0xff]  ;;  %1620 = vmatprep.subr.mxu1 %v1830_v10  ;;  %s1831_s15 = smov 104   ;;  %s1832_s16 = smov 120   ;;  %vm1833_vm1 = vmmov 0   ;;  %vm187_vm2 = vcmask 64512  }
  0x28   :  { %v46_v5 = vld [vmem:[#allocation2] sm:$0xff]  ;;  %v1704_v6 = vpack.c.bf16 %v51_v4, %v50_v2  ;;  %v47_v7 = vld [vmem:[#allocation2 + $0x8] sm:$0xff]  ;;  %1622 = vmatprep.mubr.msk.f32.mxu1 %vm1833_vm1, %v1830_v10  ;;  %s1835_s17 = smov 96   ;;  %s1837_s22 = smov 16   ;;  %vm1503_vm3 = vcmask 130048   ;;  %vm1505_vm4 = vcmask 195584  }
  0x29   :  { %1617 = vmatprep.mubr.msk.f32.mxu0 %vm59_vm0, %v46_v5  ;;  %1701 = vmatprep.subr.bf16.mxu0 %v1700_v3  ;;  %v1542_v8 = vld [vmem:[%s2077_s2] ss:$0 sm:$0xff]  ;;  %s1834_s2 = smov 112   ;;  %v1546_v50 = vld [vmem:[%s2078_s3 + $0x1] ss:$0 sm:$0xff]  ;;  %s1838_s23 = smov 24  }
  0x2a   :  { %1703 = vmatpush3.bf16.msra.mxu0 %v1700_v3  ;;  %v1545_v36 = vld [vmem:[%s2078_s3] ss:$0 sm:$0xff]  ;;  %s1836_s3 = smov 64   ;;  %s1839_s24 = smov [#allocation7]  }
  0x2b   :  { %1705 = vmatprep.subr.bf16.mxu0 %v1704_v6  ;;  %s1529_s27 = sshll.u32 %s1839_s24, 4  ;;  %s1530_s27 = int_to_ptr.vmem [resolvable:$true] %s1529_s27 }
  0x2c   :  { %s1798_s28 = scalar_lea.vmem %s1530_s27, 256  ;;  %p1803_p3 = scmp.lt.s32.totalorder %s1530_s27, %s1530_s27 }
  0x2d   :  { %p1799_p2 = scmp.ne.s32.totalorder %s1530_s27, %s1798_s28  ;;  %p1804_p4 = scmp.lt.s32.totalorder %s1798_s28, %s1798_s28 }
  0x2e   :  { %1707 = vmatpush3.bf16.msra.mxu0 %v1704_v6 }
  0x2f   :  { %1630 = vmatprep.subr.mxu0 %v1830_v10  ;;  %p1805_p5 = por %p1804_p4, %p1803_p3 }
  0x31   :  { %1618 = vmatmul.mubr.msk.f32.vlgmr.msra.gmra.mrb[0].mxu0 %vm59_vm0, %v47_v7  ;;  %p1806_p6 = pnand %p1805_p5, %p1799_p2 }
  0x32   :  { %1632 = vmatprep.mubr.msk.f32.mxu0 %vm1833_vm1, %v1830_v10 }
 0x104   :  { %v1619_v9 = vpop.f32.mrb[0].mxu0 }
 0x105   :  { %v132_v11 = vpop.f32.mrb[1].mxu0  ;;  %v1911_v13 = vadd.f32 %v1619_v9, %v1542_v8 }
 0x106   :  { %v1902_v12 = vadd.f32 %v1542_v8, %v132_v11 }
 0x107   :  { %v142_v19 = vmul.f32 0.35355338, %v1911_v13 }
 0x108   :  { %162 = vrot.lane.b32.xlu1 %v1902_v12, %s1831_s15  ;;  %158 = vrot.lane.b32.xlu0 %v1902_v12, %s1832_s16  ;;  %v141_v14 = vmul.f32 0.35355338, %v1902_v12 }
 0x10c   :  { %165 = vrot.lane.b32.xlu1 %v1911_v13, %s1832_s16  ;;  %160 = vrot.lane.b32.xlu0 %v1902_v12, %s1834_s2 }
 0x110   :  { %169 = vrot.lane.b32.xlu1 %v1911_v13, %s1831_s15  ;;  %167 = vrot.lane.b32.xlu0 %v1911_v13, %s1834_s2 }
 0x114   :  { %490 = vrot.lane.b32.xlu1 %v1911_v13, %s1835_s17  ;;  %185 = vrot.lane.b32.xlu0 %v1902_v12, %s1835_s17 }
 0x118   :  { %146 = vrot.lane.b32.xlu1 %v141_v14, %s1834_s2  ;;  %144 = vrot.lane.b32.xlu0 %v141_v14, %s1832_s16 }
 0x11c   :  { %148 = vrot.lane.b32.xlu0 %v141_v14, %s1831_s15 }
 0x17a   :  { %v1922_v15 = vpop.permute.xlu1 %162  ;;  %v1924_v16 = vpop.permute.xlu0 %158 }
 0x17b   :  { %262 = vrot.lane.b32.xlu1 %v1924_v16, %s1835_s17  ;;  %414 = vrot.lane.b32.xlu0 %v1922_v15, %s1835_s17 }
 0x17e   :  { %v1928_v17 = vpop.permute.xlu1 %165  ;;  %v1930_v18 = vpop.permute.xlu0 %160 }
 0x17f   :  { %338 = vrot.lane.b32.xlu1 %v1930_v18, %s1835_s17  ;;  %566 = vrot.lane.b32.xlu0 %v1928_v17, %s1835_s17 }
 0x182   :  { %v1935_v20 = vpop.permute.xlu0 %167  ;;  %v1938_v21 = vpop.permute.xlu1 %169 }
 0x183   :  { %151 = vrot.lane.b32.xlu1 %v142_v19, %s1832_s16  ;;  %642 = vrot.lane.b32.xlu0 %v1935_v20, %s1835_s17 }
 0x186   :  { %v186_v22 = vpop.permute.xlu0 %185  ;;  %v491_v23 = vpop.permute.xlu1 %490 }
 0x187   :  { %1621 = vmatpush3.xpose.msk.msra.mxu1 %vm187_vm2, %v186_v22  ;;  %718 = vrot.lane.b32.xlu1 %v1938_v21, %s1835_s17 }
 0x188   :  { %153 = vrot.lane.b32.xlu0 %v142_v19, %s1834_s2  ;;  %1625 = vmatprep.subr.mxu1 %v1830_v10 }
 0x18a   :  { %1623 = vmatmul.mubr.msk.f32.vlgmr.msra.gmra.mrb[0].mxu1 %vm187_vm2, %v141_v14  ;;  %v145_v24 = vpop.permute.xlu0 %144  ;;  %v147_v25 = vpop.permute.xlu1 %146 }
 0x18b   :  { %155 = vrot.lane.b32.xlu1 %v142_v19, %s1831_s15  ;;  %1627 = vmatprep.mubr.msk.f32.mxu1 %vm1833_vm1, %v1830_v10 }
 0x18e   :  { %v149_v26 = vpop.permute.xlu0 %148 }
 0x1ed   :  { %v263_v27 = vpop.permute.xlu1 %262  ;;  %v415_v28 = vpop.permute.xlu0 %414 }
 0x1ee   :  { %1626 = vmatpush3.xpose.msk.msra.mxu1 %vm187_vm2, %v263_v27 }
 0x1ef   :  { %1635 = vmatprep.subr.mxu1 %v1830_v10 }
 0x1f1   :  { %v339_v29 = vpop.permute.xlu1 %338  ;;  %v567_v30 = vpop.permute.xlu0 %566  ;;  %1628 = vmatmul.mubr.msk.f32.vlgmr.msra.gmra.mrb[2].mxu1 %vm187_vm2, %v145_v24 }
 0x1f2   :  { %1631 = vmatpush3.xpose.msk.msra.mxu0 %vm187_vm2, %v339_v29  ;;  %1636 = vmatpush3.xpose.msk.msra.mxu1 %vm187_vm2, %v415_v28 }
 0x1f3   :  { %1637 = vmatprep.mubr.msk.f32.mxu1 %vm1833_vm1, %v1830_v10  ;;  %1640 = vmatprep.subr.mxu0 %v1830_v10 }
 0x1f4   :  { %1645 = vmatprep.subr.mxu1 %v1830_v10 }
 0x1f5   :  { %1633 = vmatmul.mubr.msk.f32.vlgmr.msra.gmra.mrb[2].mxu0 %vm187_vm2, %v147_v25  ;;  %v152_v31 = vpop.permute.xlu1 %151  ;;  %1638 = vmatmul.mubr.msk.f32.vlgmr.msra.gmra.mrb[4].mxu1 %vm187_vm2, %v149_v26  ;;  %v643_v32 = vpop.permute.xlu0 %642 }
 0x1f6   :  { %1641 = vmatpush3.xpose.msk.msra.mxu0 %vm187_vm2, %v491_v23  ;;  %1646 = vmatpush3.xpose.msk.msra.mxu1 %vm187_vm2, %v567_v30 }
 0x1f7   :  { %1642 = vmatprep.mubr.msk.f32.mxu0 %vm1833_vm1, %v1830_v10  ;;  %1647 = vmatprep.mubr.msk.f32.mxu1 %vm1833_vm1, %v1830_v10 }
 0x1f8   :  { %1650 = vmatprep.subr.mxu0 %v1830_v10  ;;  %1655 = vmatprep.subr.mxu1 %v1830_v10 }
 0x1f9   :  { %1643 = vmatmul.mubr.msk.f32.vlgmr.msra.gmra.mrb[4].mxu0 %vm187_vm2, %v142_v19  ;;  %v719_v33 = vpop.permute.xlu1 %718  ;;  %1648 = vmatmul.mubr.msk.f32.vlgmr.msra.gmra.mrb[6].mxu1 %vm187_vm2, %v152_v31 }
 0x1fa   :  { %1651 = vmatpush3.xpose.msk.msra.mxu0 %vm187_vm2, %v643_v32  ;;  %1656 = vmatpush3.xpose.msk.msra.mxu1 %vm187_vm2, %v719_v33  ;;  %v154_v34 = vpop.permute.xlu0 %153 }
 0x1fb   :  { %1652 = vmatprep.mubr.msk.f32.mxu0 %vm1833_vm1, %v1830_v10  ;;  %1657 = vmatprep.mubr.msk.f32.mxu1 %vm1833_vm1, %v1830_v10 }
 0x1fc   :  { %1660 = vmatprep.subr.mxu0 %v1830_v10  ;;  %1665 = vmatprep.subr.mxu1 %v1830_v10 }
 0x1fd   :  { %v156_v35 = vpop.permute.xlu1 %155  ;;  %1653 = vmatmul.mubr.msk.f32.vlgmr.msra.gmra.mrb[6].mxu0 %vm187_vm2, %v154_v34 }
 0x1fe   :  { %1658 = vmatmul.mubr.msk.f32.vlgmr.msra.gmra.mrb[8].mxu1 %vm187_vm2, %v156_v35  ;;  %1662 = vmatprep.mubr.msk.f32.mxu0 %vm1833_vm1, %v1830_v10 }
 0x1ff   :  { %1667 = vmatprep.mubr.msk.f32.mxu1 %vm1833_vm1, %v1830_v10 }
 0x25d   :  { %v258_v37 = vpop.f32.mrb[0].mxu1 }
 0x25e   :  { %v259_v38 = vadd.f32 %v1545_v36, %v258_v37  ;;  %v1624_v39 = vpop.f32.mrb[1].mxu1 }
 0x260   :  { %v794_v40 = vsel %vm187_vm2, %v259_v38, -inf }
 0x261   :  { %795 = vmax.xlane.f32.xlu0 %v794_v40 }
 0x2c4   :  { %v334_v41 = vpop.f32.mrb[2].mxu1 }
 0x2c5   :  { %v335_v42 = vadd.f32 %v1545_v36, %v334_v41  ;;  %v1629_v43 = vpop.f32.mrb[3].mxu1 }
 0x2c7   :  { %v797_v44 = vsel %vm187_vm2, %v335_v42, -inf }
 0x2c8   :  { %v410_v45 = vpop.f32.mrb[2].mxu0  ;;  %798 = vmax.xlane.f32.xlu1 %v797_v44  ;;  %v486_v46 = vpop.f32.mrb[4].mxu1 }
 0x2c9   :  { %v411_v47 = vadd.f32 %v1545_v36, %v410_v45  ;;  %v1634_v48 = vpop.f32.mrb[3].mxu0  ;;  %v1639_v49 = vpop.f32.mrb[5].mxu1  ;;  %v487_v51 = vadd.f32 %v1545_v36, %v486_v46 }
 0x2cb   :  { %v800_v52 = vsel %vm187_vm2, %v411_v47, -inf  ;;  %v803_v60 = vsel %vm187_vm2, %v487_v51, -inf }
 0x2cc   :  { %v562_v53 = vpop.f32.mrb[4].mxu0  ;;  %801 = vmax.xlane.f32.xlu0 %v800_v52  ;;  %v638_v54 = vpop.f32.mrb[6].mxu1 }
 0x2cd   :  { %v563_v55 = vadd.f32 %v1546_v50, %v562_v53  ;;  %v1644_v56 = vpop.f32.mrb[5].mxu0  ;;  %v1649_v57 = vpop.f32.mrb[7].mxu1  ;;  %v639_v58 = vadd.f32 %v1546_v50, %v638_v54 }
 0x2cf   :  { %v806_v59 = vsel %vm187_vm2, %v563_v55, -inf  ;;  %v809_v4 = vsel %vm187_vm2, %v639_v58, -inf }
 0x2d0   :  { %v714_v61 = vpop.f32.mrb[6].mxu0  ;;  %807 = vmax.xlane.f32.xlu1 %v806_v59  ;;  %804 = vmax.xlane.f32.xlu0 %v803_v60 }
 0x2d1   :  { %v715_v62 = vadd.f32 %v1546_v50, %v714_v61  ;;  %v1654_v63 = vpop.f32.mrb[7].mxu0  ;;  %v790_v0 = vpop.f32.mrb[8].mxu1 }
 0x2d2   :  { %v1659_v1 = vpop.f32.mrb[9].mxu1  ;;  %v791_v2 = vadd.f32 %v1546_v50, %v790_v0 }
 0x2d3   :  { %v812_v3 = vsel %vm187_vm2, %v715_v62, -inf }
 0x2d4   :  { %813 = vmax.xlane.f32.xlu1 %v812_v3  ;;  %810 = vmax.xlane.f32.xlu0 %v809_v4  ;;  %v815_v5 = vsel %vm187_vm2, %v791_v2, -inf }
 0x2d8   :  { %816 = vmax.xlane.f32.xlu0 %v815_v5 }
 0x2e5   :  { %882 = vrot.lane.b32.xlu1 %v1902_v12, %s1836_s3 }
 0x2e9   :  { %1034 = vrot.lane.b32.xlu1 %v1930_v18, %s1836_s3 }
 0x2ed   :  { %1110 = vrot.lane.b32.xlu1 %v1922_v15, %s1836_s3 }
 0x2ee   :  { %958 = vrot.lane.b32.xlu0 %v1924_v16, %s1836_s3  ;;  %v796_v6 = vpop.xlane.xlu0 %795 }
 0x2ef   :  { %v818_v7 = vsub.f32 %v259_v38, %v796_v6 }
 0x2f1   :  { %1262 = vrot.lane.b32.xlu1 %v1928_v17, %s1836_s3  ;;  %v826_v8 = vmul.f32 1.442695, %v818_v7 }
 0x2f2   :  { %1186 = vrot.lane.b32.xlu0 %v1911_v13, %s1836_s3 }
 0x2f3   :  { %1722 = vpow2.f32 %v826_v8 }
 0x2fd   :  { %v2008_v9 = vpop.eup %1722 }
 0x2fe   :  { %v842_v11 = vsel %vm187_vm2, %v2008_v9, 0.0 }
 0x315   :  { %843 = vadd.xlane.f32.xlu1 %v842_v11 }
 0x355   :  { %v799_v12 = vpop.xlane.xlu1 %798 }
 0x356   :  { %v819_v14 = vsub.f32 %v335_v42, %v799_v12 }
 0x358   :  { %v828_v15 = vmul.f32 1.442695, %v819_v14 }
 0x359   :  { %v802_v16 = vpop.xlane.xlu0 %801 }
 0x35a   :  { %1724 = vpow2.f32 %v828_v15  ;;  %v820_v18 = vsub.f32 %v411_v47, %v802_v16 }
 0x35c   :  { %v830_v17 = vmul.f32 1.442695, %v820_v18 }
 0x35d   :  { %v808_v19 = vpop.xlane.xlu1 %807  ;;  %v805_v22 = vpop.xlane.xlu0 %804 }
 0x35e   :  { %1726 = vpow2.f32 %v830_v17  ;;  %v822_v13 = vsub.f32 %v563_v55, %v808_v19  ;;  %v821_v23 = vsub.f32 %v487_v51, %v805_v22 }
 0x360   :  { %v834_v24 = vmul.f32 1.442695, %v822_v13  ;;  %v832_v25 = vmul.f32 1.442695, %v821_v23 }
 0x361   :  { %v814_v26 = vpop.xlane.xlu1 %813  ;;  %v811_v27 = vpop.xlane.xlu0 %810 }
 0x362   :  { %1728 = vpow2.f32 %v834_v24  ;;  %v824_v28 = vsub.f32 %v715_v62, %v814_v26  ;;  %v823_v29 = vsub.f32 %v639_v58, %v811_v27 }
 0x363   :  { %1730 = vpow2.f32 %v832_v25 }
 0x364   :  { %v1725_v30 = vpop.eup %1724  ;;  %v838_v31 = vmul.f32 1.442695, %v824_v28  ;;  %v836_v32 = vmul.f32 1.442695, %v823_v29 }
 0x365   :  { %v883_v33 = vpop.permute.xlu1 %882  ;;  %v817_v34 = vpop.xlane.xlu0 %816  ;;  %v845_v35 = vsel %vm187_vm2, %v1725_v30, 0.0 }
 0x366   :  { %1732 = vpow2.f32 %v838_v31  ;;  %v825_v36 = vsub.f32 %v791_v2, %v817_v34  ;;  %1661 = vmatpush3.msra.mxu0 %v883_v33  ;;  %846 = vadd.xlane.f32.xlu0 %v845_v35 }
 0x367   :  { %1734 = vpow2.f32 %v836_v32  ;;  %1670 = vmatprep.subr.mxu0 %v1830_v10 }
 0x368   :  { %v1727_v37 = vpop.eup %1726  ;;  %v840_v38 = vmul.f32 1.442695, %v825_v36 }
 0x369   :  { %v959_v39 = vpop.permute.xlu0 %958  ;;  %v848_v40 = vsel %vm187_vm2, %v1727_v37, 0.0  ;;  %v1035_v51 = vpop.permute.xlu1 %1034 }
 0x36a   :  { %1736 = vpow2.f32 %v840_v38  ;;  %849 = vadd.xlane.f32.xlu1 %v848_v40  ;;  %1666 = vmatpush3.msra.mxu1 %v959_v39 }
 0x36b   :  { %1675 = vmatprep.subr.mxu1 %v1830_v10 }
 0x36c   :  { %v1729_v41 = vpop.eup %1728 }
 0x36d   :  { %v1731_v42 = vpop.eup %1730  ;;  %v854_v43 = vsel %vm187_vm2, %v1729_v41, 0.0  ;;  %v1111_v52 = vpop.permute.xlu1 %1110 }
 0x36e   :  { %855 = vadd.xlane.f32.xlu1 %v854_v43  ;;  %v851_v44 = vsel %vm187_vm2, %v1731_v42, 0.0 }
 0x36f   :  { %852 = vadd.xlane.f32.xlu0 %v851_v44 }
 0x370   :  { %v1733_v45 = vpop.eup %1732 }
 0x371   :  { %v1735_v46 = vpop.eup %1734  ;;  %v860_v47 = vsel %vm187_vm2, %v1733_v45, 0.0  ;;  %v1263_v53 = vpop.permute.xlu1 %1262 }
 0x372   :  { %861 = vadd.xlane.f32.xlu1 %v860_v47  ;;  %v857_v48 = vsel %vm187_vm2, %v1735_v46, 0.0 }
 0x373   :  { %858 = vadd.xlane.f32.xlu0 %v857_v48 }
 0x374   :  { %v2020_v49 = vpop.eup %1736 }
 0x375   :  { %v863_v50 = vsel %vm187_vm2, %v2020_v49, 0.0 }
 0x377   :  { %864 = vadd.xlane.f32.xlu0 %v863_v50 }
 0x383   :  { %1414 = vrot.lane.b32.xlu1 %v1938_v21, %s1836_s3  ;;  %v1187_v21 = vpop.permute.xlu0 %1186 }
 0x38d   :  { %1338 = vrot.lane.b32.xlu0 %v1935_v20, %s1836_s3 }
 0x3a2   :  { %v844_v54 = vpop.xlane.xlu1 %843 }
 0x3a3   :  { %1738 = vrcp.f32 %v844_v54 }
 0x3ad   :  { %v1739_v55 = vpop.eup %1738 }
 0x3ae   :  { %v874_v56 = vmul.f32 %v1739_v55, %v2008_v9 }
 0x3b0   :  { %1663 = vmatmul.mubr.msk.f32.vlgmr.msra.gmra.mrb[8].mxu0 %vm187_vm2, %v874_v56 }
 0x3b1   :  { %1671 = vmatpush3.msra.mxu0 %v1035_v51  ;;  %1672 = vmatprep.mubr.msk.f32.mxu0 %vm1833_vm1, %v1830_v10 }
 0x3b2   :  { %1680 = vmatprep.subr.mxu0 %v1830_v10 }
 0x3f3   :  { %v847_v57 = vpop.xlane.xlu0 %846 }
 0x3f4   :  { %1740 = vrcp.f32 %v847_v57 }
 0x3f7   :  { %v850_v20 = vpop.xlane.xlu1 %849 }
 0x3f8   :  { %1742 = vrcp.f32 %v850_v20 }
 0x3fb   :  { %v856_v58 = vpop.xlane.xlu1 %855 }
 0x3fc   :  { %1744 = vrcp.f32 %v856_v58  ;;  %v853_v59 = vpop.xlane.xlu0 %852 }
 0x3fd   :  { %1746 = vrcp.f32 %v853_v59 }
 0x3fe   :  { %v1741_v60 = vpop.eup %1740 }
 0x3ff   :  { %v875_v61 = vmul.f32 %v1741_v60, %v1725_v30  ;;  %v862_v62 = vpop.xlane.xlu1 %861 }
 0x400   :  { %1748 = vrcp.f32 %v862_v62  ;;  %v859_v63 = vpop.xlane.xlu0 %858 }
 0x401   :  { %1750 = vrcp.f32 %v859_v63  ;;  %1668 = vmatmul.mubr.msk.f32.vlgmr.msra.gmra.mrb[10].mxu1 %vm187_vm2, %v875_v61 }
 0x402   :  { %v1743_v0 = vpop.eup %1742  ;;  %1676 = vmatpush3.msra.mxu1 %v1111_v52  ;;  %1677 = vmatprep.mubr.msk.f32.mxu1 %vm1833_vm1, %v1830_v10 }
 0x403   :  { %v876_v1 = vmul.f32 %v1743_v0, %v1727_v37  ;;  %1685 = vmatprep.subr.mxu1 %v1830_v10  ;;  %v1415_v14 = vpop.permute.xlu1 %1414 }
 0x404   :  { %v865_v2 = vpop.xlane.xlu0 %864 }
 0x405   :  { %1752 = vrcp.f32 %v865_v2  ;;  %1673 = vmatmul.mubr.msk.f32.vlgmr.msra.gmra.mrb[10].mxu0 %vm187_vm2, %v876_v1 }
 0x406   :  { %v1745_v3 = vpop.eup %1744  ;;  %1681 = vmatpush3.msra.mxu0 %v1187_v21  ;;  %1682 = vmatprep.mubr.msk.f32.mxu0 %vm1833_vm1, %v1830_v10 }
 0x407   :  { %v1747_v4 = vpop.eup %1746  ;;  %v878_v5 = vmul.f32 %v1745_v3, %v1729_v41  ;;  %1690 = vmatprep.subr.mxu0 %v1830_v10 }
 0x408   :  { %v877_v6 = vmul.f32 %v1747_v4, %v1731_v42  ;;  %v1339_v7 = vpop.permute.xlu0 %1338 }
 0x409   :  { %1683 = vmatmul.mubr.msk.f32.vlgmr.msra.gmra.mrb[12].mxu0 %vm187_vm2, %v878_v5 }
 0x40a   :  { %v1749_v8 = vpop.eup %1748  ;;  %1678 = vmatmul.mubr.msk.f32.vlgmr.msra.gmra.mrb[12].mxu1 %vm187_vm2, %v877_v6  ;;  %1691 = vmatpush3.msra.mxu0 %v1339_v7 }
 0x40b   :  { %v1751_v9 = vpop.eup %1750  ;;  %v880_v11 = vmul.f32 %v1749_v8, %v1733_v45  ;;  %1686 = vmatpush3.msra.mxu1 %v1263_v53  ;;  %1687 = vmatprep.mubr.msk.f32.mxu1 %vm1833_vm1, %v1830_v10 }
 0x40c   :  { %v879_v12 = vmul.f32 %v1751_v9, %v1735_v46  ;;  %1692 = vmatprep.mubr.msk.f32.mxu0 %vm1833_vm1, %v1830_v10  ;;  %1695 = vmatprep.subr.mxu1 %v1830_v10 }
 0x40d   :  { %1693 = vmatmul.mubr.msk.f32.vlgmr.msra.gmra.mrb[14].mxu0 %vm187_vm2, %v880_v11 }
 0x40e   :  { %1688 = vmatmul.mubr.msk.f32.vlgmr.msra.gmra.mrb[14].mxu1 %vm187_vm2, %v879_v12 }
 0x40f   :  { %v1753_v15 = vpop.eup %1752  ;;  %1696 = vmatpush3.msra.mxu1 %v1415_v14  ;;  %1697 = vmatprep.mubr.msk.f32.mxu1 %vm1833_vm1, %v1830_v10 }
 0x410   :  { %v881_v16 = vmul.f32 %v1753_v15, %v2020_v49 }
 0x412   :  { %1698 = vmatmul.mubr.msk.f32.vlgmr.msra.gmra.mrb[16].mxu1 %vm187_vm2, %v881_v16 }
 0x483   :  { %v954_v18 = vpop.f32.mrb[8].mxu0 }
 0x484   :  { %v1664_v17 = vpop.f32.mrb[9].mxu0 }
 0x4d4   :  { %v1030_v19 = vpop.f32.mrb[10].mxu1 }
 0x4d5   :  { %1491 = vrot.lane.b32.xlu0 %v1030_v19, %s1828_s26  ;;  %v1669_v22 = vpop.f32.mrb[11].mxu1 }
 0x4d8   :  { %v1106_v13 = vpop.f32.mrb[10].mxu0 }
 0x4d9   :  { %v1674_v23 = vpop.f32.mrb[11].mxu0  ;;  %1495 = vrot.lane.b32.xlu0 %v1106_v13, %s1837_s22 }
 0x4dc   :  { %v1258_v24 = vpop.f32.mrb[12].mxu0 }
 0x4dd   :  { %v1182_v25 = vpop.f32.mrb[12].mxu1  ;;  %v1684_v26 = vpop.f32.mrb[13].mxu0 }
 0x4de   :  { %1499 = vrot.lane.b32.xlu0 %v1182_v25, %s1838_s23  ;;  %v1679_v10 = vpop.f32.mrb[13].mxu1 }
 0x4e0   :  { %v1410_v27 = vpop.f32.mrb[14].mxu0 }
 0x4e1   :  { %v1334_v28 = vpop.f32.mrb[14].mxu1  ;;  %v1694_v29 = vpop.f32.mrb[15].mxu0 }
 0x4e2   :  { %1508 = vrot.lane.b32.xlu1 %v1334_v28, %s1828_s26  ;;  %v1689_v30 = vpop.f32.mrb[15].mxu1 }
 0x4e5   :  { %v1486_v31 = vpop.f32.mrb[16].mxu1 }
 0x4e6   :  { %1512 = vrot.lane.b32.xlu1 %v1410_v27, %s1837_s22  ;;  %v1699_v32 = vpop.f32.mrb[17].mxu1 }
 0x4ea   :  { %1516 = vrot.lane.b32.xlu1 %v1486_v31, %s1838_s23 }
 0x547   :  { %v1492_v33 = vpop.permute.xlu0 %1491 }
 0x548   :  { %v1502_v35 = vsel %vm187_vm2, %v954_v18, %v1492_v33 }
 0x54b   :  { %v1496_v34 = vpop.permute.xlu0 %1495 }
 0x54c   :  { %v1504_v36 = vsel %vm1503_vm3, %v1502_v35, %v1496_v34 }
 0x550   :  { %v1500_v37 = vpop.permute.xlu0 %1499 }
 0x551   :  { %v1506_v38 = vsel %vm1505_vm4, %v1504_v36, %v1500_v37 }
 0x552   :  { %1522 = vst.msk [vmem:[#allocation7] sm:$0xff] %vm59_vm0, %v1506_v38 }
 0x554   :  { %v1509_v39 = vpop.permute.xlu1 %1508 }
 0x555   :  { %v1519_v41 = vsel %vm187_vm2, %v1258_v24, %v1509_v39 }
 0x558   :  { %v1513_v40 = vpop.permute.xlu1 %1512 }
 0x559   :  { %v1520_v42 = vsel %vm1503_vm3, %v1519_v41, %v1513_v40 }
 0x55c   :  { %v1517_v43 = vpop.permute.xlu1 %1516 }
 0x55d   :  { %v1521_v44 = vsel %vm1505_vm4, %v1520_v42, %v1517_v43 }
 0x55e   :  { %1523 = vst.msk [vmem:[#allocation7 + $0x8] sm:$0xff] %vm59_vm0, %v1521_v44 }
 0x55f   :  { %1809 = shalt.err (!%p1806_p6)
}
 0x560   :  { %s1810_s5 = scalar_lea.hbm %s2079_s4, 256 }
 0x561   :  { %p1811_p7 = scmp.ne.s32.totalorder %s2079_s4, %s1810_s5  ;;  %p1814_p8 = scmp.lt.u32.totalorder %s1810_s5, %s2079_s4 }
 0x563   :  { %p1816_p9 = pnand %p1814_p8, %p1811_p7 }
 0x565   :  { %1819 = shalt.err (!%p1816_p9)
}
 0x566   :  { %1535 = dma.vmem_to_hbm [thread:$0]  %s1530_s27, 256, %s2079_s4, [#allocation4], %s1827_s25, %s1827_s25, %s1828_s26  }
 0x567   :  { %1824 = dma.done.wait [#allocation4], 256  }
 0x568   :  { %1825 = vsyncadd [#allocation4], 4294967040 }
 0x569   :  { %1539 = vsyncpa [#allocation3], 1 }
 0x56a   :  { %1540 = vsyncpa [#allocation6], 1 }
 0x56b   :  { %1541 = vsyncpa [#allocation4], 1 }

</bundles_post_ra>
